<compile_context>
chip_gen: v7x
topology: tpu7x:2x2x1
jax: 0.10.0
libtpu: 0.0.40
codegen_flags: <defaults>
</compile_context>

<pallas_src>
import functools

import jax
import jax.numpy as jnp
from jax.experimental import pallas as pl
from jax.experimental.pallas import tpu as pltpu


MAX_TILE_B = 1024  # rows per grid step; big enough to amortize ~0.35us/step overhead


def _round_up(x, m):
    return ((x + m - 1) // m) * m


def _choose_tile(batch):
    """Batch tile: multiple of 8 sublanes, <= MAX_TILE_B, and for large batches
    guarantee >= 2 grid steps so v7x's two TensorCores both get work."""
    b8 = _round_up(batch, 8)
    if b8 <= MAX_TILE_B:
        return b8
    num_tiles = max(2, -(-b8 // MAX_TILE_B))
    return _round_up(-(-b8 // num_tiles), 8)


def dynamics_kernel(s_ref, a_ref, w1s_ref, w1a_ref, b1_ref,
                    w2_ref, b2_ref, w3_ref, b3_ref, out_ref):
    # Fused concat: [state, action] @ W1  ==  state @ W1_s + action @ W1_a
    h1 = jnp.dot(s_ref[...], w1s_ref[...], preferred_element_type=jnp.float32)
    h1 = h1 + jnp.dot(a_ref[...], w1a_ref[...], preferred_element_type=jnp.float32)
    h1 = jnp.maximum(h1 + b1_ref[...], 0.0)            # bias [1,H] broadcasts to [TB,H]

    h2 = jnp.dot(h1.astype(jnp.bfloat16), w2_ref[...],
                 preferred_element_type=jnp.float32)
    h2 = jnp.maximum(h2 + b2_ref[...], 0.0)

    y = jnp.dot(h2.astype(jnp.bfloat16), w3_ref[...],
                preferred_element_type=jnp.float32)
    out_ref[...] = (y + b3_ref[...]).astype(out_ref.dtype)   # direct [TB, state_dim] store


@jax.jit
def _forward_impl(state, action, params):
    B, state_dim = state.shape
    action_dim = action.shape[1]
    hidden_dim = params["w2"].shape[0]

    tb = _choose_tile(B)
    B_pad = _round_up(B, tb)

    # bf16 activations into the kernel (cast + pad fuse under jit).
    s = state.astype(jnp.bfloat16)
    a = action.astype(jnp.bfloat16)
    if B_pad != B:
        s = jnp.pad(s, ((0, B_pad - B), (0, 0)))
        a = jnp.pad(a, ((0, B_pad - B), (0, 0)))

    num_tiles = B_pad // tb
    const2d = lambda arr: pl.BlockSpec(arr.shape, lambda i: (0, 0))  # VMEM-resident

    flops = 2 * B_pad * ((state_dim + action_dim) * hidden_dim
                         + hidden_dim * hidden_dim
                         + hidden_dim * state_dim)
    bytes_accessed = (s.size * 2 + a.size * 2
                      + sum(int(v.size) * v.dtype.itemsize for v in params.values())
                      + B_pad * state_dim * 4)

    out = pl.pallas_call(
        dynamics_kernel,
        out_shape=jax.ShapeDtypeStruct((B_pad, state_dim), jnp.float32),
        grid=(num_tiles,),
        in_specs=[
            pl.BlockSpec((tb, state_dim), lambda i: (i, 0)),
            pl.BlockSpec((tb, action_dim), lambda i: (i, 0)),
            const2d(params["w1_s"]), const2d(params["w1_a"]), const2d(params["b1"]),
            const2d(params["w2"]), const2d(params["b2"]),
            const2d(params["w3"]), const2d(params["b3"]),
        ],
        out_specs=pl.BlockSpec((tb, state_dim), lambda i: (i, 0)),
        compiler_params=pltpu.CompilerParams(
            dimension_semantics=("parallel",)),
        cost_estimate=pl.CostEstimate(flops=int(flops), transcendentals=0,
                                      bytes_accessed=int(bytes_accessed)),
    )(s, a, params["w1_s"], params["w1_a"], params["b1"],
      params["w2"], params["b2"], params["w3"], params["b3"])

    return out[:B]


def dynamics_forward(state, action, params):
    """Pallas implementation of DynamicsModel.forward.

    state:  [B, state_dim]  (or [state_dim], mirroring _format's unsqueeze)
    action: [B, action_dim] (or [action_dim])
    params: dict from init_params (bf16 weights pre-transposed [in,out], f32 biases)
    returns next_state: [B, state_dim] float32
    """
    state = jnp.asarray(state)
    action = jnp.asarray(action)
    if state.ndim == 1:
        state = state[None, :]
    if action.ndim == 1:
        action = action[None, :]
    return _forward_impl(state, action, params)


def init_params(key, state_dim, action_dim, hidden_dim):
    """Deterministic init mirroring nn.Linear's U(-1/sqrt(fan_in), 1/sqrt(fan_in)).
    Weights stored transposed [in_features, out_features]; fc1 pre-split into
    state/action halves; weights bf16 (MXU-native), biases f32. All one-time."""
    in_dim = state_dim + action_dim
    ks = jax.random.split(key, 6)

    def lin(kw, kb, fan_in, fan_out):
        bound = 1.0 / jnp.sqrt(float(fan_in))
        w = jax.random.uniform(kw, (fan_in, fan_out), jnp.float32, -bound, bound)
        b = jax.random.uniform(kb, (1, fan_out), jnp.float32, -bound, bound)
        return w, b

    w1, b1 = lin(ks[0], ks[1], in_dim, hidden_dim)
    w2, b2 = lin(ks[2], ks[3], hidden_dim, hidden_dim)
    w3, b3 = lin(ks[4], ks[5], hidden_dim, state_dim)
    return {
        "w1_s": w1[:state_dim].astype(jnp.bfloat16),
        "w1_a": w1[state_dim:].astype(jnp.bfloat16),
        "b1": b1,
        "w2": w2.astype(jnp.bfloat16),
        "b2": b2,
        "w3": w3.astype(jnp.bfloat16),
        "b3": b3,
    }


def reference_forward(state, action, p):
    """Pure-JAX fp32 reference matching the PyTorch forward semantics.
    (The bf16 MXU operands in the kernel are the intentional source of ~1e-2
    divergence from exact f32 parity with the PyTorch model.)"""
    x = jnp.concatenate([state, action], axis=-1).astype(jnp.float32)
    w1 = jnp.concatenate([p["w1_s"], p["w1_a"]], axis=0).astype(jnp.float32)
    h1 = jax.nn.relu(x @ w1 + p["b1"])
    h2 = jax.nn.relu(h1 @ p["w2"].astype(jnp.float32) + p["b2"])
    return h2 @ p["w3"].astype(jnp.float32) + p["b3"]


if __name__ == "__main__":
    state_dim, action_dim, hidden_dim = 8, 4, 32

    key = jax.random.PRNGKey(0)
    k_params, k_state, k_action = jax.random.split(key, 3)
    params = init_params(k_params, state_dim, action_dim, hidden_dim)

    # Case 1: small batch (single tile, no padding).
    batch = 8
    state = jax.random.normal(k_state, (batch, state_dim), jnp.float32)
    action = jax.random.normal(k_action, (batch, action_dim), jnp.float32)
    next_state = jax.block_until_ready(dynamics_forward(state, action, params))
    ref = reference_forward(state, action, params)
    assert next_state.shape == (batch, state_dim)
    assert jnp.allclose(next_state, ref, atol=2e-2, rtol=2e-2), "mismatch vs reference (B=8)"

    # Case 2: batch not a multiple of 8 (exercises row padding + slice).
    batch2 = 10
    state2 = jax.random.normal(jax.random.PRNGKey(1), (batch2, state_dim), jnp.float32)
    action2 = jax.random.normal(jax.random.PRNGKey(2), (batch2, action_dim), jnp.float32)
    out2 = jax.block_until_ready(dynamics_forward(state2, action2, params))
    ref2 = reference_forward(state2, action2, params)
    assert out2.shape == (batch2, state_dim)
    assert jnp.allclose(out2, ref2, atol=2e-2, rtol=2e-2), "mismatch vs reference (B=10)"

    print("KERNEL_OK")
</pallas_src>

<mosaic_0001>
module attributes {stable_mosaic.version = 11 : i64} {
  func.func @dynamics_kernel(%arg0: i32, %arg1: memref<8x8xbf16, #tpu.memory_space<vmem>>, %arg2: memref<8x4xbf16, #tpu.memory_space<vmem>>, %arg3: memref<8x32xbf16, #tpu.memory_space<vmem>>, %arg4: memref<4x32xbf16, #tpu.memory_space<vmem>>, %arg5: memref<1x32xf32, #tpu.memory_space<vmem>>, %arg6: memref<32x32xbf16, #tpu.memory_space<vmem>>, %arg7: memref<1x32xf32, #tpu.memory_space<vmem>>, %arg8: memref<32x8xbf16, #tpu.memory_space<vmem>>, %arg9: memref<1x8xf32, #tpu.memory_space<vmem>>, %arg10: memref<8x8xf32, #tpu.memory_space<vmem>>) attributes {dimension_semantics = [#tpu.dimension_semantics<parallel>], iteration_bounds = array<i64: 1>, scalar_prefetch = 0 : i64, scratch_operands = 0 : i64, tpu.core_type = #tpu.core_type<tc>, window_params = [{transform_indices = @transform_0, window_bounds = array<i64: 8, 8>}, {transform_indices = @transform_1, window_bounds = array<i64: 8, 4>}, {pipeline_mode = #tpu.pipeline_mode<synchronous>, transform_indices = @transform_2, window_bounds = array<i64: 8, 32>}, {pipeline_mode = #tpu.pipeline_mode<synchronous>, transform_indices = @transform_3, window_bounds = array<i64: 4, 32>}, {pipeline_mode = #tpu.pipeline_mode<synchronous>, transform_indices = @transform_4, window_bounds = array<i64: 1, 32>}, {pipeline_mode = #tpu.pipeline_mode<synchronous>, transform_indices = @transform_5, window_bounds = array<i64: 32, 32>}, {pipeline_mode = #tpu.pipeline_mode<synchronous>, transform_indices = @transform_6, window_bounds = array<i64: 1, 32>}, {pipeline_mode = #tpu.pipeline_mode<synchronous>, transform_indices = @transform_7, window_bounds = array<i64: 32, 8>}, {pipeline_mode = #tpu.pipeline_mode<synchronous>, transform_indices = @transform_8, window_bounds = array<i64: 1, 8>}, {transform_indices = @transform_9, window_bounds = array<i64: 8, 8>}]} {
    %c0 = arith.constant 0 : index
    %c0_0 = arith.constant 0 : index
    %0 = vector.load %arg1[%c0, %c0_0] : memref<8x8xbf16, #tpu.memory_space<vmem>>, vector<8x8xbf16>
    %c0_1 = arith.constant 0 : index
    %c0_2 = arith.constant 0 : index
    %1 = vector.load %arg3[%c0_1, %c0_2] : memref<8x32xbf16, #tpu.memory_space<vmem>>, vector<8x32xbf16>
    %cst = arith.constant dense<0.000000e+00> : vector<8x32xf32>
    %2 = tpu.matmul %0, %1, %cst {dimension_numbers = #tpu.dot_dimension_numbers<[1], [0], [0], [1], [0, 0, 1, 1], [], []>} : vector<8x8xbf16>, vector<8x32xbf16>, vector<8x32xf32> -> vector<8x32xf32>
    %c0_3 = arith.constant 0 : index
    %c0_4 = arith.constant 0 : index
    %3 = vector.load %arg2[%c0_3, %c0_4] : memref<8x4xbf16, #tpu.memory_space<vmem>>, vector<8x4xbf16>
    %c0_5 = arith.constant 0 : index
    %c0_6 = arith.constant 0 : index
    %4 = vector.load %arg4[%c0_5, %c0_6] : memref<4x32xbf16, #tpu.memory_space<vmem>>, vector<4x32xbf16>
    %cst_7 = arith.constant dense<0.000000e+00> : vector<8x32xf32>
    %5 = tpu.matmul %3, %4, %cst_7 {dimension_numbers = #tpu.dot_dimension_numbers<[1], [0], [0], [1], [0, 0, 1, 1], [], []>} : vector<8x4xbf16>, vector<4x32xbf16>, vector<8x32xf32> -> vector<8x32xf32>
    %6 = arith.addf %2, %5 : vector<8x32xf32>
    %c0_8 = arith.constant 0 : index
    %c0_9 = arith.constant 0 : index
    %7 = vector.load %arg5[%c0_8, %c0_9] : memref<1x32xf32, #tpu.memory_space<vmem>>, vector<1x32xf32>
    %8 = vector.broadcast %7 : vector<1x32xf32> to vector<8x32xf32>
    %9 = arith.addf %6, %8 : vector<8x32xf32>
    %cst_10 = arith.constant 0.000000e+00 : f32
    %10 = vector.broadcast %cst_10 : f32 to vector<8x32xf32>
    %11 = arith.maximumf %9, %10 : vector<8x32xf32>
    %12 = arith.truncf %11 : vector<8x32xf32> to vector<8x32xbf16>
    %c0_11 = arith.constant 0 : index
    %c0_12 = arith.constant 0 : index
    %13 = vector.load %arg6[%c0_11, %c0_12] : memref<32x32xbf16, #tpu.memory_space<vmem>>, vector<32x32xbf16>
    %cst_13 = arith.constant dense<0.000000e+00> : vector<8x32xf32>
    %14 = tpu.matmul %12, %13, %cst_13 {dimension_numbers = #tpu.dot_dimension_numbers<[1], [0], [0], [1], [0, 0, 1, 1], [], []>} : vector<8x32xbf16>, vector<32x32xbf16>, vector<8x32xf32> -> vector<8x32xf32>
    %c0_14 = arith.constant 0 : index
    %c0_15 = arith.constant 0 : index
    %15 = vector.load %arg7[%c0_14, %c0_15] : memref<1x32xf32, #tpu.memory_space<vmem>>, vector<1x32xf32>
    %16 = vector.broadcast %15 : vector<1x32xf32> to vector<8x32xf32>
    %17 = arith.addf %14, %16 : vector<8x32xf32>
    %cst_16 = arith.constant 0.000000e+00 : f32
    %18 = vector.broadcast %cst_16 : f32 to vector<8x32xf32>
    %19 = arith.maximumf %17, %18 : vector<8x32xf32>
    %20 = arith.truncf %19 : vector<8x32xf32> to vector<8x32xbf16>
    %c0_17 = arith.constant 0 : index
    %c0_18 = arith.constant 0 : index
    %21 = vector.load %arg8[%c0_17, %c0_18] : memref<32x8xbf16, #tpu.memory_space<vmem>>, vector<32x8xbf16>
    %cst_19 = arith.constant dense<0.000000e+00> : vector<8x8xf32>
    %22 = tpu.matmul %20, %21, %cst_19 {dimension_numbers = #tpu.dot_dimension_numbers<[1], [0], [0], [1], [0, 0, 1, 1], [], []>} : vector<8x32xbf16>, vector<32x8xbf16>, vector<8x8xf32> -> vector<8x8xf32>
    %c0_20 = arith.constant 0 : index
    %c0_21 = arith.constant 0 : index
    %23 = vector.load %arg9[%c0_20, %c0_21] : memref<1x8xf32, #tpu.memory_space<vmem>>, vector<1x8xf32>
    %24 = vector.broadcast %23 : vector<1x8xf32> to vector<8x8xf32>
    %25 = arith.addf %22, %24 : vector<8x8xf32>
    %c0_22 = arith.constant 0 : index
    %c0_23 = arith.constant 0 : index
    %26 = vector.load %arg10[%c0_22, %c0_23] : memref<8x8xf32, #tpu.memory_space<vmem>>, vector<8x8xf32>
    tpu.vector_store %arg10[%c0_22, %c0_23], %25 {strides = array<i32>} : memref<8x8xf32, #tpu.memory_space<vmem>>, vector<8x8xf32>,
    return
  }
  func.func @transform_0(%arg0: i32) -> (i32, i32) {
    %c0_i32 = arith.constant 0 : i32
    %c0_i32_0 = arith.constant 0 : i32
    return %arg0, %c0_i32 : i32, i32
  }
  func.func @transform_1(%arg0: i32) -> (i32, i32) {
    %c0_i32 = arith.constant 0 : i32
    %c0_i32_0 = arith.constant 0 : i32
    return %arg0, %c0_i32 : i32, i32
  }
  func.func @transform_2(%arg0: i32) -> (i32, i32) {
    %c0_i32 = arith.constant 0 : i32
    %c0_i32_0 = arith.constant 0 : i32
    %c0_i32_1 = arith.constant 0 : i32
    return %c0_i32, %c0_i32_0 : i32, i32
  }
  func.func @transform_3(%arg0: i32) -> (i32, i32) {
    %c0_i32 = arith.constant 0 : i32
    %c0_i32_0 = arith.constant 0 : i32
    %c0_i32_1 = arith.constant 0 : i32
    return %c0_i32, %c0_i32_0 : i32, i32
  }
  func.func @transform_4(%arg0: i32) -> (i32, i32) {
    %c0_i32 = arith.constant 0 : i32
    %c0_i32_0 = arith.constant 0 : i32
    %c0_i32_1 = arith.constant 0 : i32
    return %c0_i32, %c0_i32_0 : i32, i32
  }
  func.func @transform_5(%arg0: i32) -> (i32, i32) {
    %c0_i32 = arith.constant 0 : i32
    %c0_i32_0 = arith.constant 0 : i32
    %c0_i32_1 = arith.constant 0 : i32
    return %c0_i32, %c0_i32_0 : i32, i32
  }
  func.func @transform_6(%arg0: i32) -> (i32, i32) {
    %c0_i32 = arith.constant 0 : i32
    %c0_i32_0 = arith.constant 0 : i32
    %c0_i32_1 = arith.constant 0 : i32
    return %c0_i32, %c0_i32_0 : i32, i32
  }
  func.func @transform_7(%arg0: i32) -> (i32, i32) {
    %c0_i32 = arith.constant 0 : i32
    %c0_i32_0 = arith.constant 0 : i32
    %c0_i32_1 = arith.constant 0 : i32
    return %c0_i32, %c0_i32_0 : i32, i32
  }
  func.func @transform_8(%arg0: i32) -> (i32, i32) {
    %c0_i32 = arith.constant 0 : i32
    %c0_i32_0 = arith.constant 0 : i32
    %c0_i32_1 = arith.constant 0 : i32
    return %c0_i32, %c0_i32_0 : i32, i32
  }
  func.func @transform_9(%arg0: i32) -> (i32, i32) {
    %c0_i32 = arith.constant 0 : i32
    %c0_i32_0 = arith.constant 0 : i32
    return %arg0, %c0_i32 : i32, i32
  }
}

</mosaic_0001>

<bundles_post_ra>
// kernel: _forward_impl.1
= control target key start
LH: loop header
LB: loop body
LE: loop exit
PB: predicated region body
PF: predicated region fallthrough
CT: control target
= control target key end

     0   :  { %vm42_vm0 = vcmask 1041408   ;;  %v374_v2 = vmov 0.0   ;;  %vm90_vm1 = vcmask 1043456   ;;  %vm38_vm2 = vcmask 31744   ;;  %s474_s0 = inlined_call_operand.vmem [shape: bf16[8,8], index: 0, kind: input, shape index: {}]   ;;  %s475_s1 = inlined_call_operand.vmem [shape: bf16[8,4], index: 1, kind: input, shape index: {}]   ;;  %s476_s2 = inlined_call_operand.vmem [shape: bf16[8,32], index: 2, kind: input, shape index: {}]   ;;  %s477_s3 = inlined_call_operand.vmem [shape: bf16[4,32], index: 3, kind: input, shape index: {}]   ;;  %s478_s4 = inlined_call_operand.vmem [shape: f32[1,32], index: 4, kind: input, shape index: {}]   ;;  %s479_s5 = inlined_call_operand.vmem [shape: bf16[32,32], index: 5, kind: input, shape index: {}]   ;;  %s480_s6 = inlined_call_operand.vmem [shape: f32[1,32], index: 6, kind: input, shape index: {}]   ;;  %s481_s7 = inlined_call_operand.vmem [shape: bf16[32,8], index: 7, kind: input, shape index: {}]   ;;  %s482_s8 = inlined_call_operand.vmem [shape: f32[1,8], index: 8, kind: input, shape index: {}]   ;;  %s483_s9 = inlined_call_operand.hbm [shape: f32[8,8], index: 9, kind: output, shape index: {}]  }
   0x1   :  { %v37_v0 = vld [vmem:[%s477_s3] sm:$0x3]  ;;  %315 = vmatprep.subr.bf16.mxu0 %v374_v2  ;;  %321 = vmatprep.subr.bf16.mxu1 %v374_v2  ;;  %vm375_vm3 = vmmov 0   ;;  %vm86_vm4 = vcmask 64512  }
   0x2   :  { %v35_v1 = vld [vmem:[%s476_s2] sm:$0xf]  ;;  %v44_v3 = vsel %vm42_vm0, %v37_v0, 0  ;;  %317 = vmatprep.mubr.msk.bf16.mxu0 %vm375_vm3, %v374_v2  ;;  %323 = vmatprep.mubr.msk.bf16.mxu1 %vm375_vm3, %v374_v2 }
   0x3   :  { %v36_v4 = vld [vmem:[%s475_s1] sm:$0xf]  ;;  %316 = vmatpush3.bf16.msra.mxu0 %v44_v3  ;;  %v92_v5 = vsel %vm90_vm1, %v35_v1, 0 }
   0x4   :  { %v34_v6 = vld [vmem:[%s474_s0] sm:$0xf]  ;;  %322 = vmatpush3.bf16.msra.mxu1 %v92_v5  ;;  %327 = vmatprep.subr.bf16.mxu0 %v374_v2 }
   0x5   :  { %335 = vmatprep.subr.bf16.mxu1 %v374_v2 }
   0x6   :  { %318 = vmatmul.mubr.msk.bf16.vlgmr.msra.gmra.mrb[0].mxu0 %vm38_vm2, %v36_v4 }
   0x7   :  { %14 = vsyncpa [#allocation3], 0  ;;  %324 = vmatmul.mubr.msk.bf16.vlgmr.msra.gmra.mrb[0].mxu1 %vm86_vm4, %v34_v6  ;;  %331 = vmatprep.mubr.msk.bf16.mxu0 %vm375_vm3, %v374_v2  ;;  %v346_v7 = vld [vmem:[%s479_s5] sm:$0xff]   ;;  %v347_v8 = vld [vmem:[%s479_s5 + $0x8] sm:$0xff]   ;;  %vm167_vm5 = vcmask 261120   ;;  %s376_s25 = smov [#allocation2]  }
   0x8   :  { %339 = vmatprep.mubr.msk.bf16.mxu1 %vm375_vm3, %v374_v2  ;;  %328 = vmatpush3.bf16.msra.mxu0 %v346_v7  ;;  %v348_v9 = vld [vmem:[%s481_s7] sm:$0xff]   ;;  %v349_v23 = vld [vmem:[%s481_s7 + $0x8] sm:$0xff]   ;;  %s286_s26 = sshll.u32 %s376_s25, 4  ;;  %s287_s26 = int_to_ptr.vmem [resolvable:$true] %s286_s26 }
   0x9   :  { %329 = vmatprep.subr.bf16.mxu0 %v374_v2  ;;  %336 = vmatpush3.bf16.msra.mxu1 %v348_v9  ;;  %v296_v12 = vld [vmem:[%s478_s4] ss:$0 sm:$0xff]  ;;  %p355_p1 = scmp.lt.s32.totalorder %s287_s26, %s287_s26 }
   0xa   :  { %337 = vmatprep.subr.bf16.mxu1 %v374_v2  ;;  %v297_v24 = vld [vmem:[%s480_s6] ss:$0 sm:$0xff]  ;;  %s350_s6 = scalar_lea.vmem %s287_s26, 128 }
   0xb   :  { %v301_v32 = vld [vmem:[%s482_s8] ss:$0 sm:$0xff]  ;;  %p351_p0 = scmp.ne.s32.totalorder %s287_s26, %s350_s6  ;;  %p356_p2 = scmp.lt.s32.totalorder %s350_s6, %s350_s6 }
   0xc   :  { %330 = vmatpush3.bf16.msra.mxu0 %v347_v8 }
   0xd   :  { %338 = vmatpush3.bf16.msra.mxu1 %v349_v23  ;;  %p357_p3 = por %p356_p2, %p355_p1 }
   0xf   :  { %p358_p4 = pnand %p357_p3, %p351_p0 }
  0xd9   :  { %v80_v10 = vpop.f32.mrb[0].mxu0 }
  0xda   :  { %v128_v11 = vpop.f32.mrb[0].mxu1  ;;  %v319_v13 = vpop.f32.mrb[1].mxu0 }
  0xdb   :  { %v129_v14 = vadd.f32 %v128_v11, %v80_v10  ;;  %v325_v15 = vpop.f32.mrb[1].mxu1  ;;  %v83_v16 = vpop.f32.mrb[2].mxu0 }
  0xdc   :  { %v131_v17 = vpop.f32.mrb[2].mxu1  ;;  %v320_v18 = vpop.f32.mrb[3].mxu0 }
  0xdd   :  { %v141_v19 = vadd.f32 %v296_v12, %v129_v14  ;;  %v326_v20 = vpop.f32.mrb[3].mxu1 }
  0xdf   :  { %v142_v21 = vmax.f32 %v141_v19, 0.0 }
  0xe1   :  { %v143_v22 = vpack.c.bf16 %v142_v21, %v142_v21 }
  0xe3   :  { %332 = vmatmul.mubr.msk.bf16.vlgmr.msra.gmra.mrb[4].mxu0 %vm167_vm5, %v143_v22 }
 0x1b6   :  { %v205_v25 = vpop.f32.mrb[4].mxu0 }
 0x1b7   :  { %v206_v26 = vadd.f32 %v297_v24, %v205_v25  ;;  %v333_v27 = vpop.f32.mrb[5].mxu0 }
 0x1b8   :  { %v208_v28 = vpop.f32.mrb[6].mxu0 }
 0x1b9   :  { %v211_v29 = vmax.f32 %v206_v26, 0.0  ;;  %v334_v30 = vpop.f32.mrb[7].mxu0 }
 0x1bb   :  { %v212_v31 = vpack.c.bf16 %v211_v29, %v211_v29 }
 0x1bd   :  { %340 = vmatmul.mubr.msk.bf16.vlgmr.msra.gmra.mrb[4].mxu1 %vm167_vm5, %v212_v31 }
 0x290   :  { %v273_v33 = vpop.f32.mrb[4].mxu1 }
 0x291   :  { %v274_v34 = vadd.f32 %v301_v32, %v273_v33  ;;  %v341_v35 = vpop.f32.mrb[5].mxu1 }
 0x292   :  { %v276_v36 = vpop.f32.mrb[6].mxu1 }
 0x293   :  { %279 = vst.msk [vmem:[#allocation2] sm:$0xff] %vm86_vm4, %v274_v34  ;;  %v342_v37 = vpop.f32.mrb[7].mxu1 }
 0x294   :  { %361 = shalt.err (!%p358_p4)
}
 0x295   :  { %s362_s8 = scalar_lea.hbm %s483_s9, 128 }
 0x296   :  { %p363_p5 = scmp.ne.s32.totalorder %s483_s9, %s362_s8  ;;  %p366_p6 = scmp.lt.u32.totalorder %s362_s8, %s483_s9 }
 0x298   :  { %p368_p7 = pnand %p366_p6, %p363_p5 }
 0x29a   :  { %371 = shalt.err (!%p368_p7)
}
 0x29b   :  { %289 = dma.vmem_to_hbm [thread:$0]  %s287_s26, 128, %s483_s9, [#allocation3]  }
 0x29c   :  { %372 = dma.done.wait [#allocation3], 128  }
 0x29d   :  { %373 = vsyncadd [#allocation3], 4294967168 }
 0x29e   :  { %293 = vsyncpa [#allocation3], 1 }

</bundles_post_ra>
